<compile_context>
chip_gen: v5e
topology: v5e:2x2
jax: 0.10.0
libtpu: 0.0.40
codegen_flags: <defaults>
</compile_context>

<pallas_src>
import jax
import jax.numpy as jnp
from jax.experimental import pallas as pl
from jax.experimental.pallas import tpu as pltpu


# ----------------------------- Pallas kernel ------------------------------

def _time_embedding_kernel(t_ref, w1_ref, b1_ref, w2_ref, b2_ref, o_ref):
    # Linear(1, hidden) on the VPU: a K=1 matmul is just a broadcast FMA.
    h = t_ref[...] * w1_ref[...] + b1_ref[...]          # (tb, hidden) f32
    h = jnp.maximum(h, 0.0)                              # ReLU
    # Linear(hidden, d_model) on the MXU: bf16 operands, f32 accumulation.
    o = jnp.dot(h.astype(jnp.bfloat16), w2_ref[...],
                preferred_element_type=jnp.float32) + b2_ref[...]
    o_ref[...] = o.astype(o_ref.dtype)


def _vmem_bytes(tb, hidden, d_model, out_bytes):
    """Rough per-step VMEM footprint (double-buffered blocks + temporaries)."""
    t_blk = 2 * tb * 128 * 4                    # (tb,1) f32 pads to 128 lanes
    out_blk = 2 * tb * d_model * out_bytes      # double-buffered output tile
    h_tmp = tb * hidden * (4 + 2)               # f32 hidden + bf16 cast copy
    weights = 2 * (2 * 8 * hidden * 4 + hidden * d_model * 2 + 8 * d_model * 4)
    return t_blk + out_blk + h_tmp + weights


def time_embedding(t, w1, b1, w2, b2, *, block_b=2048,
                   out_dtype=jnp.float32, vmem_limit_bytes=None):
    """t: (B,) or (B, 1) -> (B, d_model).

    Weights are stored transposed relative to torch.nn.Linear:
      w1: (1, hidden), b1: (hidden,), w2: (hidden, d_model), b2: (d_model,)
    """
    if t.ndim == 1:
        t = t[:, None]
    t = t.astype(jnp.float32)

    B = t.shape[0]
    hidden = w1.shape[-1]
    d_model = w2.shape[-1]
    out_bytes = jnp.dtype(out_dtype).itemsize

    # Row tile over the batch. Single full-extent block for small B; for large
    # B an 8-aligned tile, shrunk until it fits the scoped-VMEM budget
    # (16 MiB default on v5e, 32 MiB on v6e/v7x -> conservative 14 MiB here
    # unless the caller raises vmem_limit_bytes).
    tb = min(block_b, B)
    if tb < B:
        tb = max(8, (tb // 8) * 8)
        budget = vmem_limit_bytes if vmem_limit_bytes is not None else (14 << 20)
        while tb > 256 and _vmem_bytes(tb, hidden, d_model, out_bytes) > budget:
            tb //= 2
    grid = (pl.cdiv(B, tb),)   # ragged last block is masked by Pallas

    cost = pl.CostEstimate(
        flops=2 * B * hidden * d_model + 2 * B * hidden,
        transcendentals=0,
        bytes_accessed=(B * 4 + B * d_model * out_bytes
                        + 2 * hidden * 4 + hidden * d_model * 2 + d_model * 4),
    )

    cp_kwargs = dict(dimension_semantics=("parallel",))
    if vmem_limit_bytes is not None:
        cp_kwargs["vmem_limit_bytes"] = vmem_limit_bytes

    out = pl.pallas_call(
        _time_embedding_kernel,
        grid=grid,
        in_specs=[
            pl.BlockSpec((tb, 1), lambda i: (i, 0)),            # t rows
            pl.BlockSpec((1, hidden), lambda i: (0, 0)),        # w1 (resident)
            pl.BlockSpec((1, hidden), lambda i: (0, 0)),        # b1
            pl.BlockSpec((hidden, d_model), lambda i: (0, 0)),  # w2 (resident, bf16)
            pl.BlockSpec((1, d_model), lambda i: (0, 0)),       # b2
        ],
        out_specs=pl.BlockSpec((tb, d_model), lambda i: (i, 0)),
        out_shape=jax.ShapeDtypeStruct((B, d_model), out_dtype),
        compiler_params=pltpu.CompilerParams(**cp_kwargs),
        cost_estimate=cost,
    )(
        t,
        w1.reshape(1, hidden).astype(jnp.float32),
        b1.reshape(1, hidden).astype(jnp.float32),
        w2.astype(jnp.bfloat16),                 # bf16 MXU operand
        b2.reshape(1, d_model).astype(jnp.float32),
    )
    return out


# --------------------------------- main -----------------------------------

if __name__ == "__main__":
    # Small shapes consistent with the module; d_model / hidden lane-dense.
    batch = 8
    d_model = 128
    hidden_dim = 256

    key = jax.random.PRNGKey(0)
    k_t, k_w1, k_w2, k_t2 = jax.random.split(key, 4)

    # PyTorch nn.Linear weights (out, in) stored transposed as (in, out).
    w1 = jax.random.normal(k_w1, (1, hidden_dim), jnp.float32) * 0.5
    b1 = jnp.linspace(-0.1, 0.1, hidden_dim, dtype=jnp.float32)
    w2 = jax.random.normal(k_w2, (hidden_dim, d_model), jnp.float32) * 0.05
    b2 = jnp.linspace(-0.05, 0.05, d_model, dtype=jnp.float32)

    def ref_fwd(tt):
        tt = tt[:, None] if tt.ndim == 1 else tt
        return jnp.maximum(tt @ w1 + b1[None, :], 0.0) @ w2 + b2[None, :]

    # 1) (batch,) input path (module unsqueezes to (batch, 1)), single block.
    t = jax.random.uniform(k_t, (batch,), jnp.float32)
    emb = jax.block_until_ready(time_embedding(t, w1, b1, w2, b2))
    assert emb.shape == (batch, d_model)
    assert bool(jnp.all(jnp.isfinite(emb)))
    # bf16 MXU operands (f32 accumulation) -> relaxed tolerance vs f32 ref.
    assert bool(jnp.allclose(emb, ref_fwd(t), atol=2e-2, rtol=2e-2))

    # 2) Ragged grid path: B not a multiple of the tile -> masked last block.
    t2 = jax.random.uniform(k_t2, (12, 1), jnp.float32)
    emb2 = jax.block_until_ready(time_embedding(t2, w1, b1, w2, b2, block_b=8))
    assert emb2.shape == (12, d_model)
    assert bool(jnp.allclose(emb2, ref_fwd(t2), atol=2e-2, rtol=2e-2))

    # 3) Optional bf16 output for store-bound callers.
    emb3 = jax.block_until_ready(
        time_embedding(t, w1, b1, w2, b2, out_dtype=jnp.bfloat16))
    assert emb3.dtype == jnp.bfloat16 and emb3.shape == (batch, d_model)
    assert bool(jnp.all(jnp.isfinite(emb3.astype(jnp.float32))))

    print("KERNEL_OK")
</pallas_src>

<mosaic_0001>
module attributes {stable_mosaic.version = 11 : i64} {
  func.func @_time_embedding_kernel(%arg0: i32, %arg1: memref<8x1xf32, #tpu.memory_space<vmem>>, %arg2: memref<1x256xf32, #tpu.memory_space<vmem>>, %arg3: memref<1x256xf32, #tpu.memory_space<vmem>>, %arg4: memref<256x128xbf16, #tpu.memory_space<vmem>>, %arg5: memref<1x128xf32, #tpu.memory_space<vmem>>, %arg6: memref<8x128xf32, #tpu.memory_space<vmem>>) attributes {dimension_semantics = [#tpu.dimension_semantics<parallel>], iteration_bounds = array<i64: 1>, scalar_prefetch = 0 : i64, scratch_operands = 0 : i64, tpu.core_type = #tpu.core_type<tc>, window_params = [{transform_indices = @transform_0, window_bounds = array<i64: 8, 1>}, {pipeline_mode = #tpu.pipeline_mode<synchronous>, transform_indices = @transform_1, window_bounds = array<i64: 1, 256>}, {pipeline_mode = #tpu.pipeline_mode<synchronous>, transform_indices = @transform_2, window_bounds = array<i64: 1, 256>}, {pipeline_mode = #tpu.pipeline_mode<synchronous>, transform_indices = @transform_3, window_bounds = array<i64: 256, 128>}, {pipeline_mode = #tpu.pipeline_mode<synchronous>, transform_indices = @transform_4, window_bounds = array<i64: 1, 128>}, {transform_indices = @transform_5, window_bounds = array<i64: 8, 128>}]} {
    %c0 = arith.constant 0 : index
    %c0_0 = arith.constant 0 : index
    %0 = vector.load %arg1[%c0, %c0_0] : memref<8x1xf32, #tpu.memory_space<vmem>>, vector<8x1xf32>
    %c0_1 = arith.constant 0 : index
    %c0_2 = arith.constant 0 : index
    %1 = vector.load %arg2[%c0_1, %c0_2] : memref<1x256xf32, #tpu.memory_space<vmem>>, vector<1x256xf32>
    %2 = vector.broadcast %0 : vector<8x1xf32> to vector<8x256xf32>
    %3 = vector.broadcast %1 : vector<1x256xf32> to vector<8x256xf32>
    %4 = arith.mulf %2, %3 : vector<8x256xf32>
    %c0_3 = arith.constant 0 : index
    %c0_4 = arith.constant 0 : index
    %5 = vector.load %arg3[%c0_3, %c0_4] : memref<1x256xf32, #tpu.memory_space<vmem>>, vector<1x256xf32>
    %6 = vector.broadcast %5 : vector<1x256xf32> to vector<8x256xf32>
    %7 = arith.addf %4, %6 : vector<8x256xf32>
    %cst = arith.constant 0.000000e+00 : f32
    %8 = vector.broadcast %cst : f32 to vector<8x256xf32>
    %9 = arith.maximumf %7, %8 : vector<8x256xf32>
    %10 = arith.truncf %9 : vector<8x256xf32> to vector<8x256xbf16>
    %c0_5 = arith.constant 0 : index
    %c0_6 = arith.constant 0 : index
    %11 = vector.load %arg4[%c0_5, %c0_6] : memref<256x128xbf16, #tpu.memory_space<vmem>>, vector<256x128xbf16>
    %cst_7 = arith.constant dense<0.000000e+00> : vector<8x128xf32>
    %12 = tpu.matmul %10, %11, %cst_7 {dimension_numbers = #tpu.dot_dimension_numbers<[1], [0], [0], [1], [0, 0, 1, 1], [], []>} : vector<8x256xbf16>, vector<256x128xbf16>, vector<8x128xf32> -> vector<8x128xf32>
    %c0_8 = arith.constant 0 : index
    %c0_9 = arith.constant 0 : index
    %13 = vector.load %arg5[%c0_8, %c0_9] : memref<1x128xf32, #tpu.memory_space<vmem>>, vector<1x128xf32>
    %14 = vector.broadcast %13 : vector<1x128xf32> to vector<8x128xf32>
    %15 = arith.addf %12, %14 : vector<8x128xf32>
    %c0_10 = arith.constant 0 : index
    %c0_11 = arith.constant 0 : index
    %16 = vector.load %arg6[%c0_10, %c0_11] : memref<8x128xf32, #tpu.memory_space<vmem>>, vector<8x128xf32>
    tpu.vector_store %arg6[%c0_10, %c0_11], %15 {strides = array<i32>} : memref<8x128xf32, #tpu.memory_space<vmem>>, vector<8x128xf32>,
    return
  }
  func.func @transform_0(%arg0: i32) -> (i32, i32) {
    %c0_i32 = arith.constant 0 : i32
    %c0_i32_0 = arith.constant 0 : i32
    return %arg0, %c0_i32 : i32, i32
  }
  func.func @transform_1(%arg0: i32) -> (i32, i32) {
    %c0_i32 = arith.constant 0 : i32
    %c0_i32_0 = arith.constant 0 : i32
    %c0_i32_1 = arith.constant 0 : i32
    return %c0_i32, %c0_i32_0 : i32, i32
  }
  func.func @transform_2(%arg0: i32) -> (i32, i32) {
    %c0_i32 = arith.constant 0 : i32
    %c0_i32_0 = arith.constant 0 : i32
    %c0_i32_1 = arith.constant 0 : i32
    return %c0_i32, %c0_i32_0 : i32, i32
  }
  func.func @transform_3(%arg0: i32) -> (i32, i32) {
    %c0_i32 = arith.constant 0 : i32
    %c0_i32_0 = arith.constant 0 : i32
    %c0_i32_1 = arith.constant 0 : i32
    return %c0_i32, %c0_i32_0 : i32, i32
  }
  func.func @transform_4(%arg0: i32) -> (i32, i32) {
    %c0_i32 = arith.constant 0 : i32
    %c0_i32_0 = arith.constant 0 : i32
    %c0_i32_1 = arith.constant 0 : i32
    return %c0_i32, %c0_i32_0 : i32, i32
  }
  func.func @transform_5(%arg0: i32) -> (i32, i32) {
    %c0_i32 = arith.constant 0 : i32
    %c0_i32_0 = arith.constant 0 : i32
    return %arg0, %c0_i32 : i32, i32
  }
}

</mosaic_0001>

<bundles_post_ra>
// kernel: tpu_custom_call.1
= control target key start
LH: loop header
LB: loop body
LE: loop exit
PB: predicated region body
PF: predicated region fallthrough
CT: control target
= control target key end

     0   :  { %10 = vsyncpa [#allocation3], 0  ;;  %s431_s0 = inlined_call_operand.vmem [shape: f32[8,1], index: 0, kind: input, shape index: {}]   ;;  %s432_s1 = inlined_call_operand.vmem [shape: f32[1,256], index: 1, kind: input, shape index: {}]   ;;  %s433_s2 = inlined_call_operand.vmem [shape: f32[1,256], index: 2, kind: input, shape index: {}]   ;;  %s434_s3 = inlined_call_operand.hbm [shape: bf16[256,128], index: 3, kind: input, shape index: {}]   ;;  %s435_s4 = inlined_call_operand.vmem [shape: f32[1,128], index: 4, kind: input, shape index: {}]   ;;  %s436_s5 = inlined_call_operand.hbm [shape: f32[8,128], index: 5, kind: output, shape index: {}]  }
   0x1   :  { %11 = vsyncpa [#allocation4], 0  ;;  %s22_s20 = sshll.u32 %s434_s3, 4  ;;  %s378_s21 = smov [#allocation2]   ;;  %s23_s20 = int_to_ptr.hbm [resolvable:$true] %s22_s20 }
   0x2   :  { %s24_s22 = sshll.u32 %s378_s21, 4  ;;  %s379_s23 = smov 64   ;;  %s25_s22 = int_to_ptr.vmem [resolvable:$true] %s24_s22 }
   0x3   :  { %s380_s24 = smov 4  }
   0x4   :  { %30 = dma.hbm_to_vmem [thread:$0]  %s23_s20, 2048, %s25_s22, [#allocation3], %s379_s23, %s379_s23, %s380_s24  }
   0x5   :  { %374 = dma.done.wait [#allocation3], 2048  }
   0x6   :  { %375 = vsyncadd [#allocation3], 4294965248  ;;  %v381_v0 = vmov 0   ;;  %v37_v1 = vld [vmem:[%s431_s0] sm:$0xff]  ;;  %v310_v2 = vld [vmem:[#allocation2 + $0x38] sm:$0xff]  ;;  %s229_s8 = sshll.u32 %s436_s5, 4  ;;  %s230_s8 = int_to_ptr.hbm [resolvable:$true] %s229_s8 }
   0x7   :  { %324 = vset.pattern.permute.xlu0 %v381_v0  ;;  %v318_v3 = vld [vmem:[#allocation2 + $0x78] sm:$0xff]  ;;  %195 = vmatpush.bf16.msra.mxu0 %v310_v2  ;;  %v309_v4 = vld [vmem:[#allocation2 + $0x30] sm:$0xff]  ;;  %v308_v6 = vld [vmem:[#allocation2 + $0x28] sm:$0xff] }
   0x8   :  { %41 = vperm.xlu0 %324, %v37_v1   ;;  %208 = vmatpush.bf16.msra.mxu1 %v318_v3  ;;  %v317_v5 = vld [vmem:[#allocation2 + $0x70] sm:$0xff]  ;;  %v316_v7 = vld [vmem:[#allocation2 + $0x68] sm:$0xff]  ;;  %v307_v8 = vld [vmem:[#allocation2 + $0x20] sm:$0xff] }
   0x9   :  { %v315_v9 = vld [vmem:[#allocation2 + $0x60] sm:$0xff]  ;;  %v306_v10 = vld [vmem:[#allocation2 + $0x18] sm:$0xff]  ;;  %v305_v12 = vld [vmem:[#allocation2 + $0x10] sm:$0xff] }
   0xa   :  { %v314_v11 = vld [vmem:[#allocation2 + $0x58] sm:$0xff]  ;;  %v313_v13 = vld [vmem:[#allocation2 + $0x50] sm:$0xff]  ;;  %v304_v14 = vld [vmem:[#allocation2 + $0x8] sm:$0xff] }
   0xb   :  { %196 = vmatpush.bf16.msra.mxu0 %v309_v4  ;;  %v312_v15 = vld [vmem:[#allocation2 + $0x48] sm:$0xff]  ;;  %v303_v16 = vld [vmem:[#allocation2] sm:$0xff] }
   0xc   :  { %209 = vmatpush.bf16.msra.mxu1 %v317_v5  ;;  %v311_v17 = vld [vmem:[#allocation2 + $0x40] sm:$0xff] }
   0xd   :  { %v38_v18 = vld [vmem:[%s432_s1] sm:$0x3] }
   0xe   :  { %v51_v19 = vld [vmem:[%s433_s2] sm:$0x3]  ;;  %v45_v20 = vperm.slane %v38_v18, 0  ;;  %v46_v21 = vperm.slane %v38_v18, 1  ;;  %s382_s2 = smov [#allocation5]  }
   0xf   :  { %197 = vmatpush.bf16.msra.mxu0 %v308_v6  ;;  %v53_v22 = vperm.slane %v51_v19, 0  ;;  %v54_v23 = vperm.slane %v51_v19, 1  ;;  %v325_v33 = vld [vmem:[%s435_s4] ss:$0 sm:$0xff]  ;;  %s227_s30 = sshll.u32 %s382_s2, 4  ;;  %s228_s30 = int_to_ptr.vmem [resolvable:$true] %s227_s30 }
  0x10   :  { %210 = vmatpush.bf16.msra.mxu1 %v316_v7 }
  0x13   :  { %198 = vmatpush.bf16.msra.mxu0 %v307_v8 }
  0x14   :  { %211 = vmatpush.bf16.msra.mxu1 %v315_v9 }
  0x17   :  { %199 = vmatpush.bf16.msra.mxu0 %v306_v10 }
  0x18   :  { %212 = vmatpush.bf16.msra.mxu1 %v314_v11 }
  0x1b   :  { %200 = vmatpush.bf16.msra.mxu0 %v305_v12 }
  0x1c   :  { %213 = vmatpush.bf16.msra.mxu1 %v313_v13 }
  0x1f   :  { %201 = vmatpush.bf16.msra.mxu0 %v304_v14 }
  0x20   :  { %214 = vmatpush.bf16.msra.mxu1 %v312_v15 }
  0x23   :  { %202 = vmatpush.bf16.msra.mxu0 %v303_v16 }
  0x24   :  { %215 = vmatpush.bf16.msra.mxu1 %v311_v17 }
  0x7a   :  { %v42_v24 = vpop.permute.xlu0 %41 }
  0x7b   :  { %v49_v25 = vmul.f32 %v45_v20, %v42_v24  ;;  %v50_v26 = vmul.f32 %v46_v21, %v42_v24 }
  0x7d   :  { %v57_v27 = vadd.f32 %v53_v22, %v49_v25  ;;  %v58_v28 = vadd.f32 %v54_v23, %v50_v26 }
  0x7f   :  { %v59_v29 = vmax.f32 %v57_v27, 0.0  ;;  %v60_v30 = vmax.f32 %v58_v28, 0.0 }
  0x81   :  { %v61_v31 = vpack.c.bf16 %v59_v29, %v59_v29  ;;  %v62_v32 = vpack.c.bf16 %v60_v30, %v60_v30 }
  0x83   :  { %203 = vmatmul.bf16.vlgmr.msra.gmra.mxu0 %v61_v31  ;;  %216 = vmatmul.bf16.vlgmr.msra.gmra.mxu1 %v62_v32 }
 0x100   :  { %v204_v34 = vpop.f32.mrf.mxu0  ;;  %v217_v35 = vpop.f32.mrf.mxu1 }
 0x101   :  { %v205_v36 = vadd.f32 %v325_v33, %v204_v34 }
 0x103   :  { %v218_v37 = vadd.f32 %v217_v35, %v205_v36 }
 0x105   :  { %221 = vst [vmem:[#allocation5] sm:$0xff] %v218_v37 }
 0x106   :  { %232 = dma.vmem_to_hbm [thread:$0]  %s228_s30, 128, %s230_s8, [#allocation4]  }
 0x108   :  { %v206_v38 = vpop.f32.mrf.mxu0  ;;  %v219_v39 = vpop.f32.mrf.mxu1 }
 0x109   :  { %376 = dma.done.wait [#allocation4], 128  }
 0x10a   :  { %377 = vsyncadd [#allocation4], 4294967168 }
 0x10b   :  { %237 = vsyncpa [#allocation3], 1 }
 0x10c   :  { %238 = vsyncpa [#allocation4], 1 }

</bundles_post_ra>
